<compile_context>
chip_gen: v5e
topology: v5e:2x2
jax: 0.10.0
libtpu: 0.0.40
codegen_flags: <defaults>
</compile_context>

<pallas_src>
import math
import functools

import jax
import jax.numpy as jnp
from jax.experimental import pallas as pl
from jax.experimental.pallas import tpu as pltpu

_SUBLANES = 8   # f32 sublane count — batch is padded up to a multiple of this
_LANES = 128    # lane width — output feature dims are zero-padded up to this


def _round_up(n, m):
    return -(-n // m) * m


def _ponder_kernel(out_dim,
                   xh_ref, w_rnn_ref, b_rnn_ref, wp_ref, bp_ref,
                   s_ref, proj_ref):
    # Fused RNNCell pre-activation: [x, h] @ [W_ih^T ; W_hh^T] + (b_ih + b_hh).
    # Weight columns beyond state_dim are zero, so the padded lanes of `pre`
    # are exactly 0 and tanh(tanh(0)) == 0 keeps the padding clean.
    pre = (jnp.dot(xh_ref[...], w_rnn_ref[...],
                   preferred_element_type=jnp.float32)
           + b_rnn_ref[...])
    # RNNCell internal tanh, then the module's activation (tanh again).
    s = jnp.tanh(jnp.tanh(pre))
    s_ref[...] = s.astype(s_ref.dtype)          # (B_pad, state_pad) — unmasked store

    # Projection: state @ W_p^T + b_p  ->  (B_pad, out_pad)
    proj = jnp.dot(s, wp_ref[...], preferred_element_type=jnp.float32) + bp_ref[...]

    # Apply sigmoid only to the lambda lane; write a single lane-dense tile.
    col = jax.lax.broadcasted_iota(jnp.int32, proj.shape, dimension=1)
    proj = jnp.where(col == out_dim, jax.nn.sigmoid(proj), proj)
    proj_ref[...] = proj.astype(proj_ref.dtype)  # (B_pad, out_pad) — unmasked store


def prepare_params(params):
    """One-time fusion / transpose / lane-padding of parameters.

    On v6e/v7x the fused RNN weight could additionally be cast to bfloat16
    (keeping f32 accumulation) to halve the dominant weight DMA; kept f32 here
    for tight numerical agreement with the reference.
    """
    state_dim = params["w_hh"].shape[0]
    total_out = params["w_p"].shape[0]
    state_pad = _round_up(state_dim, _LANES)
    out_pad = _round_up(total_out, _LANES)

    # Fused RNN weights: (in_dim + state_dim, state_pad), zero-padded columns.
    w_rnn = jnp.concatenate([params["w_ih"].T, params["w_hh"].T], axis=0)
    w_rnn = jnp.pad(w_rnn, ((0, 0), (0, state_pad - state_dim)))
    b_rnn = jnp.pad(params["b_ih"] + params["b_hh"],
                    (0, state_pad - state_dim)).reshape(1, state_pad)

    # Projection weights: (state_pad, out_pad), zero-padded rows/columns.
    wp_t = jnp.pad(params["w_p"].T,
                   ((0, state_pad - state_dim), (0, out_pad - total_out)))
    bp = jnp.pad(params["b_p"], (0, out_pad - total_out)).reshape(1, out_pad)

    return {"w_rnn": w_rnn, "b_rnn": b_rnn, "w_p_t": wp_t, "b_p": bp,
            "state_pad": state_pad, "out_pad": out_pad}


def ponder_rnn_forward(x, state, prepared, out_dim, state_dim):
    """x: (B, ...) -> flattened to (B, in_dim). state: (B, state_dim) or None."""
    batch = x.shape[0]
    x2d = x.reshape(batch, -1).astype(jnp.float32)

    if state is None:
        state = jnp.zeros((batch, state_dim), dtype=jnp.float32)
    state = state.astype(jnp.float32)

    # Single fused matmul operand: [x, h]  -> (B_pad, in_dim + state_dim)
    xh = jnp.concatenate([x2d, state], axis=1)
    b_pad = _round_up(batch, _SUBLANES)
    if b_pad != batch:
        xh = jnp.pad(xh, ((0, b_pad - batch), (0, 0)))

    state_pad = prepared["w_rnn"].shape[1]
    out_pad = prepared["w_p_t"].shape[1]
    total_out = out_dim + 1
    kernel = functools.partial(_ponder_kernel, out_dim)

    new_state_p, proj_p = pl.pallas_call(
        kernel,
        out_shape=(
            jax.ShapeDtypeStruct((b_pad, state_pad), jnp.float32),
            jax.ShapeDtypeStruct((b_pad, out_pad), jnp.float32),
        ),
        in_specs=[
            pl.BlockSpec(memory_space=pltpu.MemorySpace.VMEM),  # [x, h]
            pl.BlockSpec(memory_space=pltpu.MemorySpace.VMEM),  # [W_ih^T ; W_hh^T] (padded)
            pl.BlockSpec(memory_space=pltpu.MemorySpace.VMEM),  # b_ih + b_hh (padded)
            pl.BlockSpec(memory_space=pltpu.MemorySpace.VMEM),  # W_p^T (padded)
            pl.BlockSpec(memory_space=pltpu.MemorySpace.VMEM),  # b_p (padded)
        ],
        out_specs=(
            pl.BlockSpec(memory_space=pltpu.MemorySpace.VMEM),
            pl.BlockSpec(memory_space=pltpu.MemorySpace.VMEM),
        ),
    )(xh, prepared["w_rnn"], prepared["b_rnn"], prepared["w_p_t"], prepared["b_p"])

    new_state = new_state_p[:batch, :state_dim]
    y_hat = proj_p[:batch, :out_dim]
    # lambda_n.squeeze() — drops the trailing singleton dim (batch > 1 case).
    lambda_n = jnp.squeeze(proj_p[:batch, out_dim:total_out], axis=-1)
    return y_hat, new_state, lambda_n, (jnp.array(0), jnp.array(0))


def init_params(key, in_dim, state_dim, out_dim):
    """Deterministic init mimicking nn.RNNCell / nn.Linear uniform ranges."""
    total_out = out_dim + 1
    k = 1.0 / math.sqrt(state_dim)
    kp = 1.0 / math.sqrt(state_dim)
    keys = jax.random.split(key, 6)
    params = {
        "w_ih": jax.random.uniform(keys[0], (state_dim, in_dim), jnp.float32, -k, k),
        "w_hh": jax.random.uniform(keys[1], (state_dim, state_dim), jnp.float32, -k, k),
        "b_ih": jax.random.uniform(keys[2], (state_dim,), jnp.float32, -k, k),
        "b_hh": jax.random.uniform(keys[3], (state_dim,), jnp.float32, -k, k),
        "w_p": jax.random.uniform(keys[4], (total_out, state_dim), jnp.float32, -kp, kp),
        "b_p": jax.random.uniform(keys[5], (total_out,), jnp.float32, -kp, kp),
    }
    return params


def reference_forward(x, state, params, out_dim, state_dim):
    """Pure-JAX reference mirroring the PyTorch module."""
    batch = x.shape[0]
    x2d = x.reshape(batch, -1)
    if state is None:
        state = jnp.zeros((batch, state_dim), dtype=jnp.float32)
    pre = (x2d @ params["w_ih"].T + params["b_ih"]
           + state @ params["w_hh"].T + params["b_hh"])
    s = jnp.tanh(jnp.tanh(pre))
    proj = s @ params["w_p"].T + params["b_p"]
    y = proj[:, :out_dim]
    lam = jax.nn.sigmoid(jnp.squeeze(proj[:, out_dim:], axis=-1))
    return y, s, lam


if __name__ == "__main__":
    key = jax.random.PRNGKey(0)
    kx, kh, kp = jax.random.split(key, 3)

    # Small shapes: x of shape (batch=2, channels=4, H=16, W=16) -> in_dim = 1024
    batch, C, H, W = 2, 4, 16, 16
    in_dim = C * H * W
    state_dim = 32
    out_dim = 8

    x = jax.random.normal(kx, (batch, C, H, W), dtype=jnp.float32)
    state0 = jax.random.normal(kh, (batch, state_dim), dtype=jnp.float32)
    params = init_params(kp, in_dim, state_dim, out_dim)

    # Hoisted once: transposes / weight stacking / bias fusion / lane padding.
    prepared = prepare_params(params)
    prepared = {k: (jnp.asarray(v) if isinstance(v, jnp.ndarray) else v)
                for k, v in prepared.items()}

    fwd = jax.jit(functools.partial(ponder_rnn_forward,
                                    out_dim=out_dim, state_dim=state_dim))

    y_hat, new_state, lambda_n, (_, _) = fwd(x, state0, prepared)
    jax.block_until_ready((y_hat, new_state, lambda_n))

    # Correctness check vs pure-JAX reference.
    y_ref, s_ref, lam_ref = reference_forward(x, state0, params, out_dim, state_dim)
    assert y_hat.shape == (batch, out_dim)
    assert new_state.shape == (batch, state_dim)
    assert lambda_n.shape == (batch,)
    assert jnp.allclose(y_hat, y_ref, atol=2e-5)
    assert jnp.allclose(new_state, s_ref, atol=2e-5)
    assert jnp.allclose(lambda_n, lam_ref, atol=2e-5)

    print("KERNEL_OK")
</pallas_src>

<mosaic_0001>
module attributes {stable_mosaic.version = 11 : i64} {
  func.func @_ponder_kernel(%arg0: memref<8x1056xf32, #tpu.memory_space<vmem>>, %arg1: memref<1056x128xf32, #tpu.memory_space<vmem>>, %arg2: memref<1x128xf32, #tpu.memory_space<vmem>>, %arg3: memref<128x128xf32, #tpu.memory_space<vmem>>, %arg4: memref<1x128xf32, #tpu.memory_space<vmem>>, %arg5: memref<8x128xf32, #tpu.memory_space<vmem>>, %arg6: memref<8x128xf32, #tpu.memory_space<vmem>>) attributes {dimension_semantics = [], scalar_prefetch = 0 : i64, scratch_operands = 0 : i64, tpu.core_type = #tpu.core_type<tc>} {
    %c0 = arith.constant 0 : index
    %c0_0 = arith.constant 0 : index
    %0 = vector.load %arg0[%c0, %c0_0] : memref<8x1056xf32, #tpu.memory_space<vmem>>, vector<8x1056xf32>
    %c0_1 = arith.constant 0 : index
    %c0_2 = arith.constant 0 : index
    %1 = vector.load %arg1[%c0_1, %c0_2] : memref<1056x128xf32, #tpu.memory_space<vmem>>, vector<1056x128xf32>
    %cst = arith.constant dense<0.000000e+00> : vector<8x128xf32>
    %2 = tpu.matmul %0, %1, %cst {dimension_numbers = #tpu.dot_dimension_numbers<[1], [0], [0], [1], [0, 0, 1, 1], [], []>} : vector<8x1056xf32>, vector<1056x128xf32>, vector<8x128xf32> -> vector<8x128xf32>
    %c0_3 = arith.constant 0 : index
    %c0_4 = arith.constant 0 : index
    %3 = vector.load %arg2[%c0_3, %c0_4] : memref<1x128xf32, #tpu.memory_space<vmem>>, vector<1x128xf32>
    %4 = vector.broadcast %3 : vector<1x128xf32> to vector<8x128xf32>
    %5 = arith.addf %2, %4 : vector<8x128xf32>
    %6 = math.tanh %5 : vector<8x128xf32>
    %7 = math.tanh %6 : vector<8x128xf32>
    %c0_5 = arith.constant 0 : index
    %c0_6 = arith.constant 0 : index
    %8 = vector.load %arg5[%c0_5, %c0_6] : memref<8x128xf32, #tpu.memory_space<vmem>>, vector<8x128xf32>
    tpu.vector_store %arg5[%c0_5, %c0_6], %7 {strides = array<i32>} : memref<8x128xf32, #tpu.memory_space<vmem>>, vector<8x128xf32>,
    %c0_7 = arith.constant 0 : index
    %c0_8 = arith.constant 0 : index
    %9 = vector.load %arg3[%c0_7, %c0_8] : memref<128x128xf32, #tpu.memory_space<vmem>>, vector<128x128xf32>
    %cst_9 = arith.constant dense<0.000000e+00> : vector<8x128xf32>
    %10 = tpu.matmul %7, %9, %cst_9 {dimension_numbers = #tpu.dot_dimension_numbers<[1], [0], [0], [1], [0, 0, 1, 1], [], []>} : vector<8x128xf32>, vector<128x128xf32>, vector<8x128xf32> -> vector<8x128xf32>
    %c0_10 = arith.constant 0 : index
    %c0_11 = arith.constant 0 : index
    %11 = vector.load %arg4[%c0_10, %c0_11] : memref<1x128xf32, #tpu.memory_space<vmem>>, vector<1x128xf32>
    %12 = vector.broadcast %11 : vector<1x128xf32> to vector<8x128xf32>
    %13 = arith.addf %10, %12 : vector<8x128xf32>
    %14 = tpu.iota {dimensions = array<i32: 1>} : vector<8x128xi32>
    %c8_i32 = arith.constant 8 : i32
    %15 = vector.broadcast %c8_i32 : i32 to vector<8x128xi32>
    %16 = arith.cmpi eq, %14, %15 : vector<8x128xi32>
    %17 = arith.negf %13 : vector<8x128xf32>
    %18 = math.exp %17 : vector<8x128xf32>
    %cst_12 = arith.constant 1.000000e+00 : f32
    %19 = vector.broadcast %cst_12 : f32 to vector<8x128xf32>
    %20 = arith.addf %19, %18 : vector<8x128xf32>
    %21 = arith.divf %19, %20 : vector<8x128xf32>
    %22 = arith.select %16, %21, %13 : vector<8x128xi1>, vector<8x128xf32>
    %c0_13 = arith.constant 0 : index
    %c0_14 = arith.constant 0 : index
    %23 = vector.load %arg6[%c0_13, %c0_14] : memref<8x128xf32, #tpu.memory_space<vmem>>, vector<8x128xf32>
    tpu.vector_store %arg6[%c0_13, %c0_14], %22 {strides = array<i32>} : memref<8x128xf32, #tpu.memory_space<vmem>>, vector<8x128xf32>,
    return
  }
}

</mosaic_0001>

<bundles_post_ra>
// kernel: ponder_rnn_forward.1
= control target key start
LH: loop header
LB: loop body
LE: loop exit
PB: predicated region body
PF: predicated region fallthrough
CT: control target
= control target key end

     0   :  { %12 = vsyncpa [#allocation3], 0  ;;  %s484_s24 = smov [#allocation2]   ;;  %s485_s26 = smov 128   ;;  %s612_s0 = inlined_call_operand.vmem [shape: f32[8,1056], index: 0, kind: input, shape index: {}]   ;;  %s613_s1 = inlined_call_operand.hbm [shape: f32[1056,128], index: 1, kind: input, shape index: {}]   ;;  %s614_s2 = inlined_call_operand.vmem [shape: f32[1,128], index: 2, kind: input, shape index: {}]   ;;  %s615_s3 = inlined_call_operand.vmem [shape: f32[128,128], index: 3, kind: input, shape index: {}]   ;;  %s616_s4 = inlined_call_operand.vmem [shape: f32[1,128], index: 4, kind: input, shape index: {}]   ;;  %s617_s5 = inlined_call_operand.vmem [shape: f32[8,128], index: 5, kind: output, shape index: {0}]   ;;  %s618_s6 = inlined_call_operand.vmem [shape: f32[8,128], index: 6, kind: output, shape index: {1}]  }
   0x1   :  { %s19_s23 = sshll.u32 %s613_s1, 4  ;;  %s21_s25 = sshll.u32 %s484_s24, 4  ;;  %s20_s23 = int_to_ptr.hbm [resolvable:$true] %s19_s23  ;;  %s22_s25 = int_to_ptr.vmem [resolvable:$true] %s21_s25 }
   0x2   :  { %s486_s27 = smov 8  }
   0x3   :  { %27 = dma.hbm_to_vmem [thread:$0]  %s20_s23, 16896, %s22_s25, [#allocation3], %s485_s26, %s485_s26, %s486_s27  }
   0x4   :  { %482 = dma.done.wait [#allocation3], 16896  }
   0x5   :  { %483 = vsyncadd [#allocation3], 4294950400  ;;  %v94_v0 = vld [vmem:[#allocation2 + $0x178] sm:$0xff]  ;;  %v93_v2 = vld [vmem:[#allocation2 + $0x170] sm:$0xff]  ;;  %vm183_vm0 = vcmask 261120  }
   0x6   :  { %v62_v1 = vld [vmem:[#allocation2 + $0x78] sm:$0xff]  ;;  %227 = vmatpush.msra.mxu2 %v94_v0  ;;  %v61_v4 = vld [vmem:[#allocation2 + $0x70] sm:$0xff]  ;;  %v92_v6 = vld [vmem:[#allocation2 + $0x168] sm:$0xff] }
   0x7   :  { %187 = vmatpush.msra.mxu0 %v62_v1  ;;  %v110_v3 = vld [vmem:[#allocation2 + $0x1f8] sm:$0xff]  ;;  %v109_v7 = vld [vmem:[#allocation2 + $0x1f0] sm:$0xff]  ;;  %v60_v8 = vld [vmem:[#allocation2 + $0x68] sm:$0xff] }
   0x8   :  { %v78_v5 = vld [vmem:[#allocation2 + $0xf8] sm:$0xff]  ;;  %247 = vmatpush.msra.mxu3 %v110_v3  ;;  %228 = vmatpush.msra.mxu2 %v93_v2  ;;  %v77_v9 = vld [vmem:[#allocation2 + $0xf0] sm:$0xff]  ;;  %v108_v10 = vld [vmem:[#allocation2 + $0x1e8] sm:$0xff] }
   0x9   :  { %207 = vmatpush.msra.mxu1 %v78_v5  ;;  %188 = vmatpush.msra.mxu0 %v61_v4  ;;  %v91_v11 = vld [vmem:[#allocation2 + $0x160] sm:$0xff]  ;;  %v76_v13 = vld [vmem:[#allocation2 + $0xe8] sm:$0xff]  ;;  %v90_v16 = vld [vmem:[#allocation2 + $0x158] sm:$0xff] }
   0xa   :  { %248 = vmatpush.msra.mxu3 %v109_v7  ;;  %v59_v12 = vld [vmem:[#allocation2 + $0x60] sm:$0xff]  ;;  %229 = vmatpush.msra.mxu2 %v92_v6  ;;  %v58_v17 = vld [vmem:[#allocation2 + $0x58] sm:$0xff]  ;;  %v89_v20 = vld [vmem:[#allocation2 + $0x150] sm:$0xff] }
   0xb   :  { %208 = vmatpush.msra.mxu1 %v77_v9  ;;  %189 = vmatpush.msra.mxu0 %v60_v8  ;;  %v107_v14 = vld [vmem:[#allocation2 + $0x1e0] sm:$0xff]  ;;  %v106_v18 = vld [vmem:[#allocation2 + $0x1d8] sm:$0xff]  ;;  %v57_v21 = vld [vmem:[#allocation2 + $0x50] sm:$0xff] }
   0xc   :  { %v75_v15 = vld [vmem:[#allocation2 + $0xe0] sm:$0xff]  ;;  %249 = vmatpush.msra.mxu3 %v108_v10  ;;  %230 = vmatpush.msra.mxu2 %v91_v11  ;;  %v74_v19 = vld [vmem:[#allocation2 + $0xd8] sm:$0xff]  ;;  %v105_v22 = vld [vmem:[#allocation2 + $0x1d0] sm:$0xff] }
   0xd   :  { %209 = vmatpush.msra.mxu1 %v76_v13  ;;  %190 = vmatpush.msra.mxu0 %v59_v12  ;;  %v73_v23 = vld [vmem:[#allocation2 + $0xd0] sm:$0xff]  ;;  %v88_v24 = vld [vmem:[#allocation2 + $0x148] sm:$0xff]  ;;  %v87_v28 = vld [vmem:[#allocation2 + $0x140] sm:$0xff] }
   0xe   :  { %250 = vmatpush.msra.mxu3 %v107_v14  ;;  %231 = vmatpush.msra.mxu2 %v90_v16  ;;  %v56_v25 = vld [vmem:[#allocation2 + $0x48] sm:$0xff]  ;;  %v55_v29 = vld [vmem:[#allocation2 + $0x40] sm:$0xff]  ;;  %v86_v32 = vld [vmem:[#allocation2 + $0x138] sm:$0xff] }
   0xf   :  { %210 = vmatpush.msra.mxu1 %v75_v15  ;;  %191 = vmatpush.msra.mxu0 %v58_v17  ;;  %v104_v26 = vld [vmem:[#allocation2 + $0x1c8] sm:$0xff]  ;;  %v103_v30 = vld [vmem:[#allocation2 + $0x1c0] sm:$0xff]  ;;  %v54_v33 = vld [vmem:[#allocation2 + $0x38] sm:$0xff] }
  0x10   :  { %251 = vmatpush.msra.mxu3 %v106_v18  ;;  %232 = vmatpush.msra.mxu2 %v89_v20  ;;  %v72_v27 = vld [vmem:[#allocation2 + $0xc8] sm:$0xff]  ;;  %v71_v31 = vld [vmem:[#allocation2 + $0xc0] sm:$0xff]  ;;  %v102_v34 = vld [vmem:[#allocation2 + $0x1b8] sm:$0xff] }
  0x11   :  { %211 = vmatpush.msra.mxu1 %v74_v19  ;;  %192 = vmatpush.msra.mxu0 %v57_v21  ;;  %v70_v35 = vld [vmem:[#allocation2 + $0xb8] sm:$0xff]  ;;  %v85_v36 = vld [vmem:[#allocation2 + $0x130] sm:$0xff]  ;;  %v84_v40 = vld [vmem:[#allocation2 + $0x128] sm:$0xff] }
  0x12   :  { %252 = vmatpush.msra.mxu3 %v105_v22  ;;  %233 = vmatpush.msra.mxu2 %v88_v24  ;;  %v53_v37 = vld [vmem:[#allocation2 + $0x30] sm:$0xff]  ;;  %v52_v41 = vld [vmem:[#allocation2 + $0x28] sm:$0xff]  ;;  %v83_v44 = vld [vmem:[#allocation2 + $0x120] sm:$0xff] }
  0x13   :  { %212 = vmatpush.msra.mxu1 %v73_v23  ;;  %193 = vmatpush.msra.mxu0 %v56_v25  ;;  %v101_v38 = vld [vmem:[#allocation2 + $0x1b0] sm:$0xff]  ;;  %v100_v42 = vld [vmem:[#allocation2 + $0x1a8] sm:$0xff]  ;;  %v51_v45 = vld [vmem:[#allocation2 + $0x20] sm:$0xff] }
  0x14   :  { %253 = vmatpush.msra.mxu3 %v104_v26  ;;  %234 = vmatpush.msra.mxu2 %v87_v28  ;;  %v69_v39 = vld [vmem:[#allocation2 + $0xb0] sm:$0xff]  ;;  %v68_v43 = vld [vmem:[#allocation2 + $0xa8] sm:$0xff]  ;;  %v99_v46 = vld [vmem:[#allocation2 + $0x1a0] sm:$0xff] }
  0x15   :  { %213 = vmatpush.msra.mxu1 %v72_v27  ;;  %194 = vmatpush.msra.mxu0 %v55_v29  ;;  %v67_v47 = vld [vmem:[#allocation2 + $0xa0] sm:$0xff]  ;;  %v82_v48 = vld [vmem:[#allocation2 + $0x118] sm:$0xff]  ;;  %v81_v52 = vld [vmem:[#allocation2 + $0x110] sm:$0xff] }
  0x16   :  { %254 = vmatpush.msra.mxu3 %v103_v30  ;;  %235 = vmatpush.msra.mxu2 %v86_v32  ;;  %v50_v49 = vld [vmem:[#allocation2 + $0x18] sm:$0xff]  ;;  %v49_v53 = vld [vmem:[#allocation2 + $0x10] sm:$0xff]  ;;  %v80_v56 = vld [vmem:[#allocation2 + $0x108] sm:$0xff] }
  0x17   :  { %214 = vmatpush.msra.mxu1 %v71_v31  ;;  %195 = vmatpush.msra.mxu0 %v54_v33  ;;  %v98_v50 = vld [vmem:[#allocation2 + $0x198] sm:$0xff]  ;;  %v97_v54 = vld [vmem:[#allocation2 + $0x190] sm:$0xff]  ;;  %v48_v57 = vld [vmem:[#allocation2 + $0x8] sm:$0xff] }
  0x18   :  { %255 = vmatpush.msra.mxu3 %v102_v34  ;;  %236 = vmatpush.msra.mxu2 %v85_v36  ;;  %v66_v51 = vld [vmem:[#allocation2 + $0x98] sm:$0xff]  ;;  %v65_v55 = vld [vmem:[#allocation2 + $0x90] sm:$0xff]  ;;  %v96_v58 = vld [vmem:[#allocation2 + $0x188] sm:$0xff] }
  0x19   :  { %215 = vmatpush.msra.mxu1 %v70_v35  ;;  %196 = vmatpush.msra.mxu0 %v53_v37  ;;  %v64_v59 = vld [vmem:[#allocation2 + $0x88] sm:$0xff]  ;;  %v79_v60 = vld [vmem:[#allocation2 + $0x100] sm:$0xff]  ;;  %v158_v62 = vld [vmem:[#allocation2 + $0x378] sm:$0xff] }
  0x1a   :  { %256 = vmatpush.msra.mxu3 %v101_v38  ;;  %237 = vmatpush.msra.mxu2 %v84_v40  ;;  %v47_v61 = vld [vmem:[#allocation2] sm:$0xff]  ;;  %v126_v0 = vld [vmem:[#allocation2 + $0x278] sm:$0xff]  ;;  %v157_v2 = vld [vmem:[#allocation2 + $0x370] sm:$0xff] }
  0x1b   :  { %216 = vmatpush.msra.mxu1 %v69_v39  ;;  %197 = vmatpush.msra.mxu0 %v52_v41  ;;  %v95_v63 = vld [vmem:[#allocation2 + $0x180] sm:$0xff]  ;;  %v174_v1 = vld [vmem:[#allocation2 + $0x3f8] sm:$0xff]  ;;  %v125_v4 = vld [vmem:[#allocation2 + $0x270] sm:$0xff] }
  0x1c   :  { %257 = vmatpush.msra.mxu3 %v100_v42  ;;  %238 = vmatpush.msra.mxu2 %v83_v44  ;;  %v63_v3 = vld [vmem:[#allocation2 + $0x80] sm:$0xff]  ;;  %v142_v5 = vld [vmem:[#allocation2 + $0x2f8] sm:$0xff]  ;;  %v156_v6 = vld [vmem:[#allocation2 + $0x368] sm:$0xff] }
  0x1d   :  { %217 = vmatpush.msra.mxu1 %v68_v43  ;;  %198 = vmatpush.msra.mxu0 %v51_v45  ;;  %v173_v7 = vld [vmem:[#allocation2 + $0x3f0] sm:$0xff]  ;;  %v124_v8 = vld [vmem:[#allocation2 + $0x268] sm:$0xff]  ;;  %v155_v10 = vld [vmem:[#allocation2 + $0x360] sm:$0xff] }
  0x1e   :  { %258 = vmatpush.msra.mxu3 %v99_v46  ;;  %239 = vmatpush.msra.mxu2 %v82_v48  ;;  %v141_v9 = vld [vmem:[#allocation2 + $0x2f0] sm:$0xff]  ;;  %v172_v11 = vld [vmem:[#allocation2 + $0x3e8] sm:$0xff]  ;;  %v123_v12 = vld [vmem:[#allocation2 + $0x260] sm:$0xff] }
  0x1f   :  { %218 = vmatpush.msra.mxu1 %v67_v47  ;;  %199 = vmatpush.msra.mxu0 %v50_v49  ;;  %v140_v13 = vld [vmem:[#allocation2 + $0x2e8] sm:$0xff]  ;;  %v154_v14 = vld [vmem:[#allocation2 + $0x358] sm:$0xff]  ;;  %v171_v15 = vld [vmem:[#allocation2 + $0x3e0] sm:$0xff] }
  0x20   :  { %259 = vmatpush.msra.mxu3 %v98_v50  ;;  %240 = vmatpush.msra.mxu2 %v81_v52  ;;  %v122_v16 = vld [vmem:[#allocation2 + $0x258] sm:$0xff]  ;;  %v139_v17 = vld [vmem:[#allocation2 + $0x2e0] sm:$0xff]  ;;  %v153_v18 = vld [vmem:[#allocation2 + $0x350] sm:$0xff] }
  0x21   :  { %219 = vmatpush.msra.mxu1 %v66_v51  ;;  %200 = vmatpush.msra.mxu0 %v49_v53  ;;  %v170_v19 = vld [vmem:[#allocation2 + $0x3d8] sm:$0xff]  ;;  %v121_v20 = vld [vmem:[#allocation2 + $0x250] sm:$0xff]  ;;  %v152_v22 = vld [vmem:[#allocation2 + $0x348] sm:$0xff] }
  0x22   :  { %260 = vmatpush.msra.mxu3 %v97_v54  ;;  %241 = vmatpush.msra.mxu2 %v80_v56  ;;  %v138_v21 = vld [vmem:[#allocation2 + $0x2d8] sm:$0xff]  ;;  %v169_v23 = vld [vmem:[#allocation2 + $0x3d0] sm:$0xff]  ;;  %v120_v24 = vld [vmem:[#allocation2 + $0x248] sm:$0xff] }
  0x23   :  { %220 = vmatpush.msra.mxu1 %v65_v55  ;;  %201 = vmatpush.msra.mxu0 %v48_v57  ;;  %v137_v25 = vld [vmem:[#allocation2 + $0x2d0] sm:$0xff]  ;;  %v151_v26 = vld [vmem:[#allocation2 + $0x340] sm:$0xff]  ;;  %v168_v27 = vld [vmem:[#allocation2 + $0x3c8] sm:$0xff] }
  0x24   :  { %261 = vmatpush.msra.mxu3 %v96_v58  ;;  %242 = vmatpush.msra.mxu2 %v79_v60  ;;  %v119_v28 = vld [vmem:[#allocation2 + $0x240] sm:$0xff]  ;;  %v136_v29 = vld [vmem:[#allocation2 + $0x2c8] sm:$0xff]  ;;  %v150_v30 = vld [vmem:[#allocation2 + $0x338] sm:$0xff] }
  0x25   :  { %221 = vmatpush.msra.mxu1 %v64_v59  ;;  %202 = vmatpush.msra.mxu0 %v47_v61  ;;  %v167_v31 = vld [vmem:[#allocation2 + $0x3c0] sm:$0xff]  ;;  %v118_v32 = vld [vmem:[#allocation2 + $0x238] sm:$0xff]  ;;  %v149_v34 = vld [vmem:[#allocation2 + $0x330] sm:$0xff] }
  0x26   :  { %307 = vmatpush.msrb.mxu2 %v158_v62  ;;  %262 = vmatpush.msra.mxu3 %v95_v63  ;;  %v135_v33 = vld [vmem:[#allocation2 + $0x2c0] sm:$0xff]  ;;  %v166_v35 = vld [vmem:[#allocation2 + $0x3b8] sm:$0xff]  ;;  %v117_v36 = vld [vmem:[#allocation2 + $0x230] sm:$0xff] }
  0x27   :  { %267 = vmatpush.msrb.mxu0 %v126_v0  ;;  %222 = vmatpush.msra.mxu1 %v63_v3  ;;  %v134_v37 = vld [vmem:[#allocation2 + $0x2b8] sm:$0xff]  ;;  %v148_v38 = vld [vmem:[#allocation2 + $0x328] sm:$0xff]  ;;  %v165_v39 = vld [vmem:[#allocation2 + $0x3b0] sm:$0xff] }
  0x28   :  { %327 = vmatpush.msrb.mxu3 %v174_v1  ;;  %308 = vmatpush.msrb.mxu2 %v157_v2  ;;  %v116_v40 = vld [vmem:[#allocation2 + $0x228] sm:$0xff]  ;;  %v133_v41 = vld [vmem:[#allocation2 + $0x2b0] sm:$0xff]  ;;  %v147_v42 = vld [vmem:[#allocation2 + $0x320] sm:$0xff] }
  0x29   :  { %268 = vmatpush.msrb.mxu0 %v125_v4  ;;  %287 = vmatpush.msrb.mxu1 %v142_v5  ;;  %v164_v43 = vld [vmem:[#allocation2 + $0x3a8] sm:$0xff]  ;;  %v40_v44 = vld [vmem:[%s612_s0 + $0x10] sm:$0xff]  ;;  %v115_v45 = vld [vmem:[#allocation2 + $0x220] sm:$0xff] }
  0x2a   :  { %309 = vmatpush.msrb.mxu2 %v156_v6  ;;  %328 = vmatpush.msrb.mxu3 %v173_v7  ;;  %v132_v46 = vld [vmem:[#allocation2 + $0x2a8] sm:$0xff]  ;;  %v146_v47 = vld [vmem:[#allocation2 + $0x318] sm:$0xff]  ;;  %v163_v48 = vld [vmem:[#allocation2 + $0x3a0] sm:$0xff] }
  0x2b   :  { %269 = vmatpush.msrb.mxu0 %v124_v8  ;;  %288 = vmatpush.msrb.mxu1 %v141_v9  ;;  %v38_v49 = vld [vmem:[%s612_s0] sm:$0xff]  ;;  %v41_v50 = vld [vmem:[%s612_s0 + $0x18] sm:$0xff]  ;;  %v145_v53 = vld [vmem:[#allocation2 + $0x310] sm:$0xff] }
  0x2c   :  { %310 = vmatpush.msrb.mxu2 %v155_v10  ;;  %329 = vmatpush.msrb.mxu3 %v172_v11  ;;  %v114_v51 = vld [vmem:[#allocation2 + $0x218] sm:$0xff]  ;;  %v131_v52 = vld [vmem:[#allocation2 + $0x2a0] sm:$0xff]  ;;  %v39_v55 = vld [vmem:[%s612_s0 + $0x8] sm:$0xff] }
  0x2d   :  { %270 = vmatpush.msrb.mxu0 %v123_v12  ;;  %289 = vmatpush.msrb.mxu1 %v140_v13  ;;  %v162_v54 = vld [vmem:[#allocation2 + $0x398] sm:$0xff]  ;;  %v113_v56 = vld [vmem:[#allocation2 + $0x210] sm:$0xff]  ;;  %v144_v58 = vld [vmem:[#allocation2 + $0x308] sm:$0xff] }
  0x2e   :  { %311 = vmatpush.msrb.mxu2 %v154_v14  ;;  %330 = vmatpush.msrb.mxu3 %v171_v15  ;;  %v130_v57 = vld [vmem:[#allocation2 + $0x298] sm:$0xff]  ;;  %v161_v59 = vld [vmem:[#allocation2 + $0x390] sm:$0xff]  ;;  %v112_v60 = vld [vmem:[#allocation2 + $0x208] sm:$0xff] }
  0x2f   :  { %271 = vmatpush.msrb.mxu0 %v122_v16  ;;  %290 = vmatpush.msrb.mxu1 %v139_v17  ;;  %v129_v61 = vld [vmem:[#allocation2 + $0x290] sm:$0xff]  ;;  %v143_v62 = vld [vmem:[#allocation2 + $0x300] sm:$0xff]  ;;  %v160_v63 = vld [vmem:[#allocation2 + $0x388] sm:$0xff] }
  0x30   :  { %312 = vmatpush.msrb.mxu2 %v153_v18  ;;  %331 = vmatpush.msrb.mxu3 %v170_v19  ;;  %v44_v0 = vld [vmem:[%s612_s0 + $0x30] sm:$0xff]  ;;  %v111_v1 = vld [vmem:[#allocation2 + $0x200] sm:$0xff]  ;;  %v128_v2 = vld [vmem:[#allocation2 + $0x288] sm:$0xff] }
  0x31   :  { %272 = vmatpush.msrb.mxu0 %v121_v20  ;;  %291 = vmatpush.msrb.mxu1 %v138_v21  ;;  %v159_v3 = vld [vmem:[#allocation2 + $0x380] sm:$0xff]  ;;  %v45_v5 = vld [vmem:[%s612_s0 + $0x38] sm:$0xff]  ;;  %v43_v8 = vld [vmem:[%s612_s0 + $0x28] sm:$0xff] }
  0x32   :  { %313 = vmatpush.msrb.mxu2 %v152_v22  ;;  %332 = vmatpush.msrb.mxu3 %v169_v23  ;;  %v42_v4 = vld [vmem:[%s612_s0 + $0x20] sm:$0xff]  ;;  %v178_v6 = vld [vmem:[#allocation2 + $0x418] sm:$0xff]  ;;  %v177_v9 = vld [vmem:[#allocation2 + $0x410] sm:$0xff] }
  0x33   :  { %273 = vmatpush.msrb.mxu0 %v120_v24  ;;  %292 = vmatpush.msrb.mxu1 %v137_v25  ;;  %v127_v7 = vld [vmem:[#allocation2 + $0x280] sm:$0xff]  ;;  %v176_v10 = vld [vmem:[#allocation2 + $0x408] sm:$0xff]  ;;  %v385_v13 = vld [vmem:[%s615_s3 + $0x78] sm:$0xff] }
  0x34   :  { %314 = vmatpush.msrb.mxu2 %v151_v26  ;;  %333 = vmatpush.msrb.mxu3 %v168_v27  ;;  %v175_v11 = vld [vmem:[#allocation2 + $0x400] sm:$0xff]  ;;  %v384_v14 = vld [vmem:[%s615_s3 + $0x70] sm:$0xff]  ;;  %v383_v15 = vld [vmem:[%s615_s3 + $0x68] sm:$0xff] }
  0x35   :  { %274 = vmatpush.msrb.mxu0 %v119_v28  ;;  %293 = vmatpush.msrb.mxu1 %v136_v29  ;;  %v46_v12 = vld [vmem:[%s612_s0 + $0x40] sm:$0xff]  ;;  %v381_v17 = vld [vmem:[%s615_s3 + $0x58] sm:$0xff]  ;;  %v380_v18 = vld [vmem:[%s615_s3 + $0x50] sm:$0xff] }
  0x36   :  { %315 = vmatpush.msrb.mxu2 %v150_v30  ;;  %334 = vmatpush.msrb.mxu3 %v167_v31  ;;  %v382_v16 = vld [vmem:[%s615_s3 + $0x60] sm:$0xff]  ;;  %v379_v19 = vld [vmem:[%s615_s3 + $0x48] sm:$0xff]  ;;  %v377_v21 = vld [vmem:[%s615_s3 + $0x38] sm:$0xff] }
  0x37   :  { %275 = vmatpush.msrb.mxu0 %v118_v32  ;;  %294 = vmatpush.msrb.mxu1 %v135_v33  ;;  %v378_v20 = vld [vmem:[%s615_s3 + $0x40] sm:$0xff]  ;;  %v376_v22 = vld [vmem:[%s615_s3 + $0x30] sm:$0xff]  ;;  %v375_v23 = vld [vmem:[%s615_s3 + $0x28] sm:$0xff] }
  0x38   :  { %316 = vmatpush.msrb.mxu2 %v149_v34  ;;  %335 = vmatpush.msrb.mxu3 %v166_v35  ;;  %v374_v24 = vld [vmem:[%s615_s3 + $0x20] sm:$0xff]  ;;  %v373_v25 = vld [vmem:[%s615_s3 + $0x18] sm:$0xff]  ;;  %v372_v27 = vld [vmem:[%s615_s3 + $0x10] sm:$0xff] }
  0x39   :  { %276 = vmatpush.msrb.mxu0 %v117_v36  ;;  %295 = vmatpush.msrb.mxu1 %v134_v37  ;;  %v448_v26 = vld [vmem:[%s614_s2] ss:$0 sm:$0xff]  ;;  %v371_v28 = vld [vmem:[%s615_s3 + $0x8] sm:$0xff] }
  0x3a   :  { %317 = vmatpush.msrb.mxu2 %v148_v38  ;;  %336 = vmatpush.msrb.mxu3 %v165_v39  ;;  %v370_v31 = vld [vmem:[%s615_s3] sm:$0xff] }
  0x3b   :  { %277 = vmatpush.msrb.mxu0 %v116_v40  ;;  %296 = vmatpush.msrb.mxu1 %v133_v41 }
  0x3c   :  { %318 = vmatpush.msrb.mxu2 %v147_v42  ;;  %337 = vmatpush.msrb.mxu3 %v164_v43 }
  0x3d   :  { %243 = vmatmul.f32.vlgmr.msra.gmra.mxu2 %v40_v44  ;;  %278 = vmatpush.msrb.mxu0 %v115_v45 }
  0x3e   :  { %297 = vmatpush.msrb.mxu1 %v132_v46  ;;  %319 = vmatpush.msrb.mxu2 %v146_v47 }
  0x3f   :  { %338 = vmatpush.msrb.mxu3 %v163_v48  ;;  %203 = vmatmul.f32.vlgmr.msra.gmra.mxu0 %v38_v49 }
  0x40   :  { %263 = vmatmul.f32.vlgmr.msra.gmra.mxu3 %v41_v50  ;;  %279 = vmatpush.msrb.mxu0 %v114_v51  ;;  %v449_v50 = vld [vmem:[%s616_s4] ss:$0 sm:$0xff] }
  0x41   :  { %298 = vmatpush.msrb.mxu1 %v131_v52  ;;  %320 = vmatpush.msrb.mxu2 %v145_v53 }
  0x42   :  { %339 = vmatpush.msrb.mxu3 %v162_v54  ;;  %223 = vmatmul.f32.vlgmr.msra.gmra.mxu1 %v39_v55 }
  0x43   :  { %280 = vmatpush.msrb.mxu0 %v113_v56  ;;  %299 = vmatpush.msrb.mxu1 %v130_v57  ;;  %v410_v57 = vlaneseq }
  0x44   :  { %321 = vmatpush.msrb.mxu2 %v144_v58  ;;  %340 = vmatpush.msrb.mxu3 %v161_v59 }
  0x45   :  { %281 = vmatpush.msrb.mxu0 %v112_v60  ;;  %300 = vmatpush.msrb.mxu1 %v129_v61  ;;  %v411_v60 = vand.u32 127, %v410_v57 }
  0x46   :  { %322 = vmatpush.msrb.mxu2 %v143_v62  ;;  %341 = vmatpush.msrb.mxu3 %v160_v63 }
  0x47   :  { %323 = vmatmul.f32.vlgmr.msrb.gmra.mxu2 %v44_v0  ;;  %282 = vmatpush.msrb.mxu0 %v111_v1  ;;  %vm412_vm3 = vcmp.eq.s32.totalorder %v411_v60, 8 }
  0x48   :  { %301 = vmatpush.msrb.mxu1 %v128_v2  ;;  %342 = vmatpush.msrb.mxu3 %v159_v3 }
  0x49   :  { %283 = vmatmul.f32.vlgmr.msrb.gmra.mxu0 %v42_v4  ;;  %343 = vmatmul.f32.vlgmr.msrb.gmra.mxu3 %v45_v5 }
  0x4a   :  { %359 = vmatpush.msra.mxu0 %v178_v6  ;;  %302 = vmatpush.msrb.mxu1 %v127_v7 }
  0x4b   :  { %303 = vmatmul.f32.vlgmr.msrb.gmra.mxu1 %v43_v8 }
  0x4c   :  { %360 = vmatpush.msra.mxu0 %v177_v9  ;;  %390 = vmatpush.msra.mxu1 %v385_v13 }
  0x4e   :  { %361 = vmatpush.msra.mxu0 %v176_v10  ;;  %391 = vmatpush.msra.mxu1 %v384_v14 }
  0x50   :  { %362 = vmatpush.msra.mxu0 %v175_v11  ;;  %392 = vmatpush.msra.mxu1 %v383_v15 }
  0x51   :  { %443 = vmatmul.msk.f32.vlgmr.msra.gmra.mxu0 %vm183_vm0, %v46_v12 }
  0x52   :  { %393 = vmatpush.msra.mxu1 %v382_v16 }
  0x54   :  { %394 = vmatpush.msra.mxu1 %v381_v17 }
  0x56   :  { %395 = vmatpush.msra.mxu1 %v380_v18 }
  0x58   :  { %396 = vmatpush.msra.mxu1 %v379_v19 }
  0x5a   :  { %397 = vmatpush.msra.mxu1 %v378_v20 }
  0x5c   :  { %398 = vmatpush.msra.mxu1 %v377_v21 }
  0x5e   :  { %399 = vmatpush.msra.mxu1 %v376_v22 }
  0x60   :  { %400 = vmatpush.msra.mxu1 %v375_v23 }
  0x62   :  { %401 = vmatpush.msra.mxu1 %v374_v24 }
  0x64   :  { %402 = vmatpush.msra.mxu1 %v373_v25 }
  0x66   :  { %403 = vmatpush.msra.mxu1 %v372_v27 }
  0x68   :  { %404 = vmatpush.msra.mxu1 %v371_v28 }
  0x6a   :  { %405 = vmatpush.msra.mxu1 %v370_v31 }
  0xbc   :  { %v204_v29 = vpop.f32.mrf.mxu0 }
  0xbd   :  { %v205_v30 = vadd.f32 %v448_v26, %v204_v29 }
  0xbf   :  { %v224_v32 = vpop.f32.mrf.mxu1 }
  0xc0   :  { %v225_v33 = vadd.f32 %v224_v32, %v205_v30  ;;  %v244_v34 = vpop.f32.mrf.mxu2 }
  0xc2   :  { %v245_v35 = vadd.f32 %v244_v34, %v225_v33 }
  0xc3   :  { %v264_v36 = vpop.f32.mrf.mxu3 }
  0xc4   :  { %v265_v37 = vadd.f32 %v264_v36, %v245_v35 }
  0xc6   :  { %v284_v38 = vpop.f32.mrf.mxu0 }
  0xc7   :  { %v285_v39 = vadd.f32 %v284_v38, %v265_v37 }
  0xc8   :  { %v304_v40 = vpop.f32.mrf.mxu1 }
  0xc9   :  { %v305_v41 = vadd.f32 %v304_v40, %v285_v39 }
  0xca   :  { %v324_v42 = vpop.f32.mrf.mxu2 }
  0xcb   :  { %v325_v43 = vadd.f32 %v324_v42, %v305_v41 }
  0xcc   :  { %v344_v44 = vpop.f32.mrf.mxu3 }
  0xcd   :  { %v345_v45 = vadd.f32 %v344_v44, %v325_v43 }
  0xce   :  { %v364_v46 = vpop.f32.mrf.mxu0 }
  0xcf   :  { %v365_v47 = vadd.f32 %v364_v46, %v345_v45 }
  0xd1   :  { %450 = vtanh.f32 %v365_v47 }
  0xd7   :  { %v451_v48 = vpop.eup %450 }
  0xd8   :  { %452 = vtanh.f32 %v451_v48 }
  0xde   :  { %v453_v49 = vpop.eup %452 }
  0xdf   :  { %369 = vst [vmem:[%s617_s5] sm:$0xff] %v453_v49  ;;  %406 = vmatmul.f32.vlgmr.msra.gmra.mxu1 %v453_v49 }
 0x15c   :  { %v407_v51 = vpop.f32.mrf.mxu1 }
 0x15d   :  { %v408_v52 = vadd.f32 %v449_v50, %v407_v51 }
 0x15f   :  { %v444_v53 = vmul.f32 -1.442695, %v408_v52 }
 0x161   :  { %454 = vpow2.f32 %v444_v53 }
 0x167   :  { %v455_v54 = vpop.eup %454 }
 0x168   :  { %v416_v55 = vadd.f32 1.0, %v455_v54 }
 0x16a   :  { %456 = vrcp.f32 %v416_v55  ;;  %v428_v61 = vand.u32 2147483648, %v416_v55  ;;  %v426_v63 = vand.u32 2147483647, %v416_v55  ;;  %vm422_vm2 = vweird.f32 %v416_v55 }
 0x16c   :  { %v429_v1 = vor.u32 1.1754944e-38, %v428_v61  ;;  %vm427_vm5 = vcmp.eq.f32.partialorder %v426_v63, 8.507059e+37 }
 0x170   :  { %v457_v56 = vpop.eup %456 }
 0x171   :  { %v418_v58 = vmul.f32 %v457_v56, %v416_v55  ;;  %vm423_vm1 = vweird.f32 %v457_v56 }
 0x172   :  { %vm424_vm4 = vmor %vm422_vm2, %vm423_vm1 }
 0x173   :  { %v419_v59 = vsub.f32 1.0, %v418_v58 }
 0x175   :  { %v420_v62 = vmul.f32 %v457_v56, %v419_v59 }
 0x177   :  { %v421_v0 = vadd.f32 %v457_v56, %v420_v62 }
 0x179   :  { %v425_v2 = vsel %vm424_vm4, %v457_v56, %v421_v0 }
 0x17a   :  { %v430_v3 = vsel %vm427_vm5, %v429_v1, %v425_v2 }
 0x17b   :  { %v432_v4 = vsel %vm412_vm3, %v430_v3, %v408_v52 }
 0x17c   :  { %433 = vst [vmem:[%s618_s6] sm:$0xff] %v432_v4 }
 0x17d   :  { %442 = vsyncpa [#allocation3], 1 }

</bundles_post_ra>
